<compile_context>
chip_gen: v7x
topology: tpu7x:2x2x1
jax: 0.10.0
libtpu: 0.0.40
codegen_flags: <defaults>
</compile_context>

<pallas_src>
import functools

import jax
import jax.numpy as jnp
from jax.experimental import pallas as pl
from jax.experimental.pallas import tpu as pltpu


# ---------------------------------------------------------------------------
# Kernel 1: per-window summary (masked mean -> linear_in -> q/k/v -> attention)
# ---------------------------------------------------------------------------
def _summary_kernel(x_ref, mask_ref, w_all_ref, wq_ref, pos_ref, out_ref, *,
                    proj_dim, v_dim, scale):
    G, N, F = x_ref.shape
    P, V = proj_dim, v_dim

    m = mask_ref[...].reshape(G, N).astype(jnp.float32)          # 1.0 = padded
    keep = 1.0 - m
    length = jnp.maximum(jnp.sum(keep, axis=-1, keepdims=True), 1.0)       # (G, 1)
    keep_scaled = keep * pl.reciprocal(length, approx=True)                # (G, N)

    # One shared-LHS MXU matmul for linear_in / k_proj / v_proj.
    x2 = x_ref[...].reshape(G * N, F)
    proj = jnp.dot(x2, w_all_ref[...], preferred_element_type=jnp.float32)
    proj = proj.reshape(G, N, 2 * P + V)
    xi = proj[:, :, :P]                                # linear_in(x)      (G,N,P)
    k = proj[:, :, P:2 * P] + pos_ref[...]             # k_proj(x) + pos   (G,N,P)
    v = proj[:, :, 2 * P:]                             # v_proj(x)         (G,N,V)

    # Masked mean.  linear_in has no bias, so mean-then-linear == linear-then-mean.
    we = jnp.maximum(jnp.sum(keep_scaled[:, :, None] * xi, axis=1), 0.0)   # (G, P)
    q = jnp.dot(we, wq_ref[...], preferred_element_type=jnp.float32) * scale

    # Single-query attention scores per window: broadcast-multiply + lane reduce.
    dots = jnp.sum(q[:, None, :] * k, axis=-1)                             # (G, N)
    neg = -jnp.finfo(jnp.float32).max
    dots = jnp.where(m > 0.0, neg, dots)
    dots = dots - jnp.max(dots, axis=-1, keepdims=True)
    e = jnp.exp(dots)
    attn = e * pl.reciprocal(jnp.sum(e, axis=-1, keepdims=True), approx=True)
    # TODO(synk): nn.Dropout(0.1) on attn omitted (eval/inference semantics).

    out_ref[...] = jnp.sum(attn[:, :, None] * v, axis=1)[:, None, :]       # (G,1,V)


# ---------------------------------------------------------------------------
# Kernel 2: fused output write  out[..., :F] = x ; out[..., F:] = shifted summary
# ---------------------------------------------------------------------------
def _concat_kernel(x_ref, s_ref, out_ref):
    G, N, F = x_ref.shape
    V = s_ref.shape[-1]
    out_ref[:, :, :F] = x_ref[...].astype(out_ref.dtype)
    s = s_ref[...].reshape(G, V).astype(out_ref.dtype)
    out_ref[:, :, F:] = jnp.broadcast_to(s[:, None, :], (G, N, V))


# ---------------------------------------------------------------------------
# Helpers / parameters
# ---------------------------------------------------------------------------
def scaled_sinu_embedding(n, dim):
    """ScaledSinuEmbedding.forward(n); scale parameter applied by caller."""
    inv_freq = 1.0 / (10000.0 ** (jnp.arange(0, dim, 2, dtype=jnp.float32) / dim))
    t = jnp.arange(n, dtype=jnp.float32)
    sinu = t[:, None] * inv_freq[None, :]
    return jnp.concatenate([jnp.sin(sinu), jnp.cos(sinu)], axis=-1)         # (n, dim)


def init_params(key, n_feats):
    P, V = n_feats // 2, n_feats // 4
    ks = jax.random.split(key, 4)

    def lin(k, fan_in, fan_out):
        bound = 1.0 / float(fan_in) ** 0.5
        # stored already transposed: y = x @ W
        return jax.random.uniform(k, (fan_in, fan_out), jnp.float32, -bound, bound)

    return dict(
        wi=lin(ks[0], n_feats, P),                   # linear_in
        wq=lin(ks[1], P, P),                         # q_proj
        wk=lin(ks[2], n_feats, P),                   # k_proj
        wv=lin(ks[3], n_feats, V),                   # v_proj
        bos=jnp.zeros((1, 1, 1, V), jnp.float32),    # nn.init.zeros_
        pos_scale=jnp.ones((), jnp.float32),         # ScaledSinuEmbedding.scale
    )


def _pick_group(total, target):
    """Largest group size <= target that evenly divides `total`."""
    g = max(1, min(int(target), int(total)))
    while total % g:
        g -= 1
    return g


# ---------------------------------------------------------------------------
# Forward
# ---------------------------------------------------------------------------
def window_embeddings_forward(x, mask, params, *, group=64):
    B, W, N, F = x.shape
    P, V = F // 2, F // 4
    scale = float(P) ** -0.5
    BW = B * W
    G = _pick_group(BW, group)
    num_groups = BW // G

    x_flat = x.reshape(BW, N, F)
    mask_f = mask.astype(jnp.float32).reshape(BW, 1, N)

    pos = scaled_sinu_embedding(N, P) * params["pos_scale"]                 # (N, P)
    # Fused projection weights: [linear_in | k_proj | v_proj]  -> (F, 2P+V)
    w_all = jnp.concatenate([params["wi"], params["wk"], params["wv"]],
                            axis=1).astype(x.dtype)
    wq = params["wq"].astype(jnp.float32)

    summary_kernel = functools.partial(_summary_kernel, proj_dim=P, v_dim=V,
                                       scale=scale)
    summ = pl.pallas_call(
        summary_kernel,
        out_shape=jax.ShapeDtypeStruct((BW, 1, V), jnp.float32),
        grid_spec=pltpu.PrefetchScalarGridSpec(
            num_scalar_prefetch=0,
            grid=(num_groups,),
            in_specs=[
                pl.BlockSpec((G, N, F), lambda i: (i, 0, 0)),        # x
                pl.BlockSpec((G, 1, N), lambda i: (i, 0, 0)),        # mask
                pl.BlockSpec((F, 2 * P + V), lambda i: (0, 0)),      # [Wi|Wk|Wv]
                pl.BlockSpec((P, P), lambda i: (0, 0)),              # Wq
                pl.BlockSpec((N, P), lambda i: (0, 0)),              # pos emb
            ],
            out_specs=pl.BlockSpec((G, 1, V), lambda i: (i, 0, 0)),
        ),
        compiler_params=pltpu.CompilerParams(
            dimension_semantics=("parallel",)),
    )(x_flat, mask_f, w_all, wq, pos)

    # BOS shift along the window axis: tiny (B, W, V) op, done in plain JAX.
    summ_b = summ.reshape(B, W, V)
    bos = jnp.broadcast_to(params["bos"].reshape(1, 1, V).astype(jnp.float32),
                           (B, 1, V))
    shifted = jnp.concatenate([bos, summ_b], axis=1)[:, :-1]                # (B,W,V)
    shifted_flat = shifted.reshape(BW, 1, V)

    out = pl.pallas_call(
        _concat_kernel,
        out_shape=jax.ShapeDtypeStruct((BW, N, F + V), x.dtype),
        grid_spec=pltpu.PrefetchScalarGridSpec(
            num_scalar_prefetch=0,
            grid=(num_groups,),
            in_specs=[
                pl.BlockSpec((G, N, F), lambda i: (i, 0, 0)),        # x
                pl.BlockSpec((G, 1, V), lambda i: (i, 0, 0)),        # shifted summ
            ],
            out_specs=pl.BlockSpec((G, N, F + V), lambda i: (i, 0, 0)),
        ),
        compiler_params=pltpu.CompilerParams(
            dimension_semantics=("parallel",)),
    )(x_flat, shifted_flat)

    return out.reshape(B, W, N, F + V)


# ---------------------------------------------------------------------------
# Pure-JAX reference (mirrors the PyTorch module)
# ---------------------------------------------------------------------------
def _reference(x, mask, params):
    B, W, N, F = x.shape
    P, V = F // 2, F // 4
    lengths = jnp.maximum((~mask).sum(-1), 1).astype(jnp.float32)[..., None, None]
    we = jnp.where(mask[..., None], 0.0, x) @ params["wi"]
    we = we.sum(-2, keepdims=True) / lengths
    we = jnp.maximum(we, 0.0)
    q = we @ params["wq"]
    k = x @ params["wk"] + scaled_sinu_embedding(N, P) * params["pos_scale"]
    v = x @ params["wv"]
    dots = jnp.einsum('bwid,bwjd->bwij', q, k) * (float(P) ** -0.5)
    dots = jnp.where(mask[:, :, None, :], -jnp.finfo(jnp.float32).max, dots)
    attn = jax.nn.softmax(dots, axis=-1)
    out = jnp.einsum('bwij,bwjd->bwid', attn, v)
    bos = jnp.broadcast_to(params["bos"], (B, 1, 1, V))
    out = jnp.concatenate([bos, out], axis=1)[:, :-1]
    out = jnp.broadcast_to(out, (B, W, N, V))
    return jnp.concatenate([x, out], axis=-1)


if __name__ == "__main__":
    key = jax.random.PRNGKey(0)
    B, W, N, F = 2, 4, 8, 32                     # n_feats=32 -> proj 16, v_dim 8
    kx, kp = jax.random.split(key)

    x = jax.random.normal(kx, (B, W, N, F), dtype=jnp.float32)
    # deterministic mask: last 2 tokens of every window padded; one fully
    # padded window to exercise the lengths==0 guard.
    tok = jnp.arange(N)
    mask = jnp.broadcast_to(tok >= N - 2, (B, W, N))
    mask = mask.at[0, 1].set(True)

    params = init_params(kp, F)

    out = window_embeddings_forward(x, mask, params)
    out = jax.block_until_ready(out)
    assert out.shape == (B, W, N, F + F // 4), out.shape
    assert out.dtype == jnp.float32

    ref = _reference(x, mask, params)
    max_err = float(jnp.max(jnp.abs(out - ref)))
    assert jnp.allclose(out, ref, atol=1e-2, rtol=1e-2), max_err
    print("KERNEL_OK")
</pallas_src>

<mosaic_0001>
module attributes {stable_mosaic.version = 11 : i64} {
  func.func @_summary_kernel(%arg0: i32, %arg1: memref<8x8x32xf32, #tpu.memory_space<vmem>>, %arg2: memref<8x1x8xf32, #tpu.memory_space<vmem>>, %arg3: memref<32x40xf32, #tpu.memory_space<vmem>>, %arg4: memref<16x16xf32, #tpu.memory_space<vmem>>, %arg5: memref<8x16xf32, #tpu.memory_space<vmem>>, %arg6: memref<8x1x8xf32, #tpu.memory_space<vmem>>) attributes {dimension_semantics = [#tpu.dimension_semantics<parallel>], iteration_bounds = array<i64: 1>, scalar_prefetch = 0 : i64, scratch_operands = 0 : i64, tpu.core_type = #tpu.core_type<tc>, window_params = [{transform_indices = @transform_0, window_bounds = array<i64: 8, 8, 32>}, {transform_indices = @transform_1, window_bounds = array<i64: 8, 1, 8>}, {pipeline_mode = #tpu.pipeline_mode<synchronous>, transform_indices = @transform_2, window_bounds = array<i64: 32, 40>}, {pipeline_mode = #tpu.pipeline_mode<synchronous>, transform_indices = @transform_3, window_bounds = array<i64: 16, 16>}, {pipeline_mode = #tpu.pipeline_mode<synchronous>, transform_indices = @transform_4, window_bounds = array<i64: 8, 16>}, {transform_indices = @transform_5, window_bounds = array<i64: 8, 1, 8>}]} {
    %c0 = arith.constant 0 : index
    %c0_0 = arith.constant 0 : index
    %c0_1 = arith.constant 0 : index
    %0 = vector.load %arg2[%c0, %c0_0, %c0_1] : memref<8x1x8xf32, #tpu.memory_space<vmem>>, vector<8x1x8xf32>
    %1 = vector.shape_cast %0 : vector<8x1x8xf32> to vector<8x8xf32>
    %cst = arith.constant 1.000000e+00 : f32
    %2 = vector.broadcast %cst : f32 to vector<8x8xf32>
    %3 = arith.subf %2, %1 : vector<8x8xf32>
    %cst_2 = arith.constant dense<0.000000e+00> : vector<8xf32>
    %4 = vector.multi_reduction <add>, %3, %cst_2 [1] : vector<8x8xf32> to vector<8xf32>
    %5 = vector.shape_cast %4 : vector<8xf32> to vector<8x1xf32>
    %cst_3 = arith.constant 1.000000e+00 : f32
    %6 = vector.broadcast %cst_3 : f32 to vector<8x1xf32>
    %7 = arith.maximumf %5, %6 : vector<8x1xf32>
    %8 = tpu.reciprocal %7 {approx = true} : vector<8x1xf32> -> vector<8x1xf32>
    %9 = vector.broadcast %8 : vector<8x1xf32> to vector<8x8xf32>
    %10 = arith.mulf %3, %9 : vector<8x8xf32>
    %c0_4 = arith.constant 0 : index
    %c0_5 = arith.constant 0 : index
    %c0_6 = arith.constant 0 : index
    %11 = vector.load %arg1[%c0_4, %c0_5, %c0_6] : memref<8x8x32xf32, #tpu.memory_space<vmem>>, vector<8x8x32xf32>
    %12 = vector.shape_cast %11 : vector<8x8x32xf32> to vector<64x32xf32>
    %c0_7 = arith.constant 0 : index
    %c0_8 = arith.constant 0 : index
    %13 = vector.load %arg3[%c0_7, %c0_8] : memref<32x40xf32, #tpu.memory_space<vmem>>, vector<32x40xf32>
    %cst_9 = arith.constant dense<0.000000e+00> : vector<64x40xf32>
    %14 = tpu.matmul %12, %13, %cst_9 {dimension_numbers = #tpu.dot_dimension_numbers<[1], [0], [0], [1], [0, 0, 1, 1], [], []>} : vector<64x32xf32>, vector<32x40xf32>, vector<64x40xf32> -> vector<64x40xf32>
    %15 = vector.shape_cast %14 : vector<64x40xf32> to vector<8x8x40xf32>
    %16 = vector.extract_strided_slice %15 {offsets = [0, 0, 0], sizes = [8, 8, 16], strides = [1, 1, 1]} : vector<8x8x40xf32> to vector<8x8x16xf32>
    %17 = vector.extract_strided_slice %15 {offsets = [0, 0, 16], sizes = [8, 8, 16], strides = [1, 1, 1]} : vector<8x8x40xf32> to vector<8x8x16xf32>
    %c0_10 = arith.constant 0 : index
    %c0_11 = arith.constant 0 : index
    %18 = vector.load %arg5[%c0_10, %c0_11] : memref<8x16xf32, #tpu.memory_space<vmem>>, vector<8x16xf32>
    %19 = vector.shape_cast %18 : vector<8x16xf32> to vector<1x8x16xf32>
    %20 = vector.broadcast %19 : vector<1x8x16xf32> to vector<8x8x16xf32>
    %21 = arith.addf %17, %20 : vector<8x8x16xf32>
    %22 = vector.extract_strided_slice %15 {offsets = [0, 0, 32], sizes = [8, 8, 8], strides = [1, 1, 1]} : vector<8x8x40xf32> to vector<8x8x8xf32>
    %23 = vector.shape_cast %10 : vector<8x8xf32> to vector<8x8x1xf32>
    %24 = vector.broadcast %23 : vector<8x8x1xf32> to vector<8x8x16xf32>
    %25 = arith.mulf %24, %16 : vector<8x8x16xf32>
    %cst_12 = arith.constant dense<0.000000e+00> : vector<8x16xf32>
    %26 = vector.multi_reduction <add>, %25, %cst_12 [1] : vector<8x8x16xf32> to vector<8x16xf32>
    %cst_13 = arith.constant 0.000000e+00 : f32
    %27 = vector.broadcast %cst_13 : f32 to vector<8x16xf32>
    %28 = arith.maximumf %26, %27 : vector<8x16xf32>
    %c0_14 = arith.constant 0 : index
    %c0_15 = arith.constant 0 : index
    %29 = vector.load %arg4[%c0_14, %c0_15] : memref<16x16xf32, #tpu.memory_space<vmem>>, vector<16x16xf32>
    %cst_16 = arith.constant dense<0.000000e+00> : vector<8x16xf32>
    %30 = tpu.matmul %28, %29, %cst_16 {dimension_numbers = #tpu.dot_dimension_numbers<[1], [0], [0], [1], [0, 0, 1, 1], [], []>} : vector<8x16xf32>, vector<16x16xf32>, vector<8x16xf32> -> vector<8x16xf32>
    %cst_17 = arith.constant 2.500000e-01 : f32
    %31 = vector.broadcast %cst_17 : f32 to vector<8x16xf32>
    %32 = arith.mulf %30, %31 : vector<8x16xf32>
    %33 = vector.shape_cast %32 : vector<8x16xf32> to vector<8x1x16xf32>
    %34 = vector.broadcast %33 : vector<8x1x16xf32> to vector<8x8x16xf32>
    %35 = arith.mulf %34, %21 : vector<8x8x16xf32>
    %cst_18 = arith.constant dense<0.000000e+00> : vector<8x8xf32>
    %36 = vector.multi_reduction <add>, %35, %cst_18 [2] : vector<8x8x16xf32> to vector<8x8xf32>
    %cst_19 = arith.constant 0.000000e+00 : f32
    %37 = vector.broadcast %cst_19 : f32 to vector<8x8xf32>
    %38 = arith.cmpf ogt, %1, %37 : vector<8x8xf32>
    %cst_20 = arith.constant -3.40282347E+38 : f32
    %39 = vector.broadcast %cst_20 : f32 to vector<8x8xf32>
    %40 = arith.select %38, %39, %36 : vector<8x8xi1>, vector<8x8xf32>
    %cst_21 = arith.constant dense<0xFF800000> : vector<8xf32>
    %41 = vector.multi_reduction <maximumf>, %40, %cst_21 [1] : vector<8x8xf32> to vector<8xf32>
    %42 = vector.shape_cast %41 : vector<8xf32> to vector<8x1xf32>
    %43 = vector.broadcast %42 : vector<8x1xf32> to vector<8x8xf32>
    %44 = arith.subf %40, %43 : vector<8x8xf32>
    %45 = math.exp %44 : vector<8x8xf32>
    %cst_22 = arith.constant dense<0.000000e+00> : vector<8xf32>
    %46 = vector.multi_reduction <add>, %45, %cst_22 [1] : vector<8x8xf32> to vector<8xf32>
    %47 = vector.shape_cast %46 : vector<8xf32> to vector<8x1xf32>
    %48 = tpu.reciprocal %47 {approx = true} : vector<8x1xf32> -> vector<8x1xf32>
    %49 = vector.broadcast %48 : vector<8x1xf32> to vector<8x8xf32>
    %50 = arith.mulf %45, %49 : vector<8x8xf32>
    %51 = vector.shape_cast %50 : vector<8x8xf32> to vector<8x8x1xf32>
    %52 = vector.broadcast %51 : vector<8x8x1xf32> to vector<8x8x8xf32>
    %53 = arith.mulf %52, %22 : vector<8x8x8xf32>
    %cst_23 = arith.constant dense<0.000000e+00> : vector<8x8xf32>
    %54 = vector.multi_reduction <add>, %53, %cst_23 [1] : vector<8x8x8xf32> to vector<8x8xf32>
    %55 = vector.shape_cast %54 : vector<8x8xf32> to vector<8x1x8xf32>
    %c0_24 = arith.constant 0 : index
    %c0_25 = arith.constant 0 : index
    %c0_26 = arith.constant 0 : index
    %56 = vector.load %arg6[%c0_24, %c0_25, %c0_26] : memref<8x1x8xf32, #tpu.memory_space<vmem>>, vector<8x1x8xf32>
    tpu.vector_store %arg6[%c0_24, %c0_25, %c0_26], %55 {strides = array<i32>} : memref<8x1x8xf32, #tpu.memory_space<vmem>>, vector<8x1x8xf32>,
    return
  }
  func.func @transform_0(%arg0: i32) -> (i32, i32, i32) {
    %c0_i32 = arith.constant 0 : i32
    %c0_i32_0 = arith.constant 0 : i32
    %c0_i32_1 = arith.constant 0 : i32
    return %arg0, %c0_i32, %c0_i32_0 : i32, i32, i32
  }
  func.func @transform_1(%arg0: i32) -> (i32, i32, i32) {
    %c0_i32 = arith.constant 0 : i32
    %c0_i32_0 = arith.constant 0 : i32
    %c0_i32_1 = arith.constant 0 : i32
    return %arg0, %c0_i32, %c0_i32_0 : i32, i32, i32
  }
  func.func @transform_2(%arg0: i32) -> (i32, i32) {
    %c0_i32 = arith.constant 0 : i32
    %c0_i32_0 = arith.constant 0 : i32
    %c0_i32_1 = arith.constant 0 : i32
    return %c0_i32, %c0_i32_0 : i32, i32
  }
  func.func @transform_3(%arg0: i32) -> (i32, i32) {
    %c0_i32 = arith.constant 0 : i32
    %c0_i32_0 = arith.constant 0 : i32
    %c0_i32_1 = arith.constant 0 : i32
    return %c0_i32, %c0_i32_0 : i32, i32
  }
  func.func @transform_4(%arg0: i32) -> (i32, i32) {
    %c0_i32 = arith.constant 0 : i32
    %c0_i32_0 = arith.constant 0 : i32
    %c0_i32_1 = arith.constant 0 : i32
    return %c0_i32, %c0_i32_0 : i32, i32
  }
  func.func @transform_5(%arg0: i32) -> (i32, i32, i32) {
    %c0_i32 = arith.constant 0 : i32
    %c0_i32_0 = arith.constant 0 : i32
    %c0_i32_1 = arith.constant 0 : i32
    return %arg0, %c0_i32, %c0_i32_0 : i32, i32, i32
  }
}

</mosaic_0001>

<bundles_post_ra>
// kernel: tpu_custom_call.1
= control target key start
LH: loop header
LB: loop body
LE: loop exit
PB: predicated region body
PF: predicated region fallthrough
CT: control target
= control target key end

     0   :  { %10 = vsyncpa [#allocation3], 0  ;;  %s2750_s0 = inlined_call_operand.hbm [shape: f32[8,8,32], index: 0, kind: input, shape index: {}]   ;;  %s2751_s1 = inlined_call_operand.hbm [shape: f32[8,1,8], index: 1, kind: input, shape index: {}]   ;;  %s2752_s2 = inlined_call_operand.hbm [shape: f32[32,40], index: 2, kind: input, shape index: {}]   ;;  %s2753_s3 = inlined_call_operand.hbm [shape: f32[16,16], index: 3, kind: input, shape index: {}]   ;;  %s2754_s4 = inlined_call_operand.vmem [shape: f32[8,16], index: 4, kind: input, shape index: {}]   ;;  %s2755_s5 = inlined_call_operand.hbm [shape: f32[8,1,8], index: 5, kind: output, shape index: {}]  }
   0x1   :  { %11 = vsyncpa [#allocation6], 0 }
   0x2   :  { %12 = vsyncpa [#allocation9], 0 }
   0x3   :  { %13 = vsyncpa [#allocation4], 0  ;;  %s2234_s18 = smov [#allocation5]   ;;  %s2116_s22 = scalar_lea.hbm %s2751_s1, 128 }
   0x4   :  { %s31_s19 = sshll.u32 %s2234_s18, 4  ;;  %p2117_p0 = scmp.ne.s32.totalorder %s2751_s1, %s2116_s22  ;;  %s32_s19 = int_to_ptr.vmem [resolvable:$true] %s31_s19 }
   0x5   :  { %p2120_p1 = scmp.lt.u32.totalorder %s2116_s22, %s2751_s1 }
   0x7   :  { %p2122_p2 = pnand %p2120_p1, %p2117_p0 }
   0x9   :  { %2125 = shalt.err (!%p2122_p2)
}
   0xa   :  { %s2126_s27 = scalar_lea.vmem %s32_s19, 128  ;;  %p2131_p4 = scmp.lt.s32.totalorder %s32_s19, %s32_s19 }
   0xb   :  { %p2127_p3 = scmp.ne.s32.totalorder %s32_s19, %s2126_s27  ;;  %p2132_p5 = scmp.lt.s32.totalorder %s2126_s27, %s2126_s27 }
   0xd   :  { %p2133_p6 = por %p2132_p5, %p2131_p4 }
   0xf   :  { %p2134_p7 = pnand %p2133_p6, %p2127_p3 }
  0x11   :  { %2137 = shalt.err (!%p2134_p7)
}
  0x12   :  { %s2235_s28 = smov 16   ;;  %s2236_s29 = smov 1  }
  0x13   :  { %37 = dma.hbm_to_vmem [thread:$0]  %s2751_s1, 128, %s32_s19, [#allocation6], %s2235_s28, %s2235_s28, %s2236_s29  }
  0x14   :  { %s2237_s7 = smov [#allocation2]   ;;  %s2138_s11 = scalar_lea.hbm %s2750_s0, 1024 }
  0x15   :  { %s19_s8 = sshll.u32 %s2237_s7, 4  ;;  %p2139_p8 = scmp.ne.s32.totalorder %s2750_s0, %s2138_s11  ;;  %s20_s8 = int_to_ptr.vmem [resolvable:$true] %s19_s8 }
  0x16   :  { %p2142_p9 = scmp.lt.u32.totalorder %s2138_s11, %s2750_s0 }
  0x18   :  { %p2144_p10 = pnand %p2142_p9, %p2139_p8 }
  0x1a   :  { %2147 = shalt.err (!%p2144_p10)
}
  0x1b   :  { %s2148_s16 = scalar_lea.vmem %s20_s8, 1024  ;;  %p2153_p12 = scmp.lt.s32.totalorder %s20_s8, %s20_s8 }
  0x1c   :  { %p2149_p11 = scmp.ne.s32.totalorder %s20_s8, %s2148_s16  ;;  %p2154_p13 = scmp.lt.s32.totalorder %s2148_s16, %s2148_s16 }
  0x1e   :  { %p2155_p0 = por %p2154_p13, %p2153_p12 }
  0x20   :  { %p2156_p1 = pnand %p2155_p0, %p2149_p11 }
  0x22   :  { %2159 = shalt.err (!%p2156_p1)
}
  0x23   :  { %s2238_s1 = smov 128   ;;  %s2239_s17 = smov 8  }
  0x24   :  { %25 = dma.hbm_to_vmem [thread:$0]  %s2750_s0, 1024, %s20_s8, [#allocation3], %s2238_s1, %s2238_s1, %s2239_s17  }
  0x25   :  { %s2240_s20 = smov [#allocation7]   ;;  %s2241_s22 = smov [#allocation8]  }
  0x26   :  { %s43_s21 = sshll.u32 %s2240_s20, 4  ;;  %s55_s23 = sshll.u32 %s2241_s22, 4  ;;  %s44_s21 = int_to_ptr.vmem [resolvable:$true] %s43_s21  ;;  %s2310_s23 = int_to_ptr.vmem [resolvable:$true] %s55_s23 }
  0x27   :  { %s2160_s26 = scalar_lea.hbm %s2752_s2, 512 }
  0x28   :  { %p2161_p2 = scmp.ne.s32.totalorder %s2752_s2, %s2160_s26  ;;  %p2164_p3 = scmp.lt.u32.totalorder %s2160_s26, %s2752_s2 }
  0x2a   :  { %p2166_p4 = pnand %p2164_p3, %p2161_p2 }
  0x2c   :  { %2169 = shalt.err (!%p2166_p4)
}
  0x2d   :  { %s2170_s0 = scalar_lea.vmem %s44_s21, 512  ;;  %p2175_p6 = scmp.lt.s32.totalorder %s44_s21, %s44_s21 }
  0x2e   :  { %p2171_p5 = scmp.ne.s32.totalorder %s44_s21, %s2170_s0  ;;  %p2176_p7 = scmp.lt.s32.totalorder %s2170_s0, %s2170_s0 }
  0x30   :  { %p2177_p8 = por %p2176_p7, %p2175_p6 }
  0x32   :  { %p2178_p9 = pnand %p2177_p8, %p2171_p5 }
  0x34   :  { %2181 = shalt.err (!%p2178_p9)
}
  0x35   :  { %49 = dma.hbm_to_vmem [thread:$0]  %s2752_s2, 512, %s44_s21, [#allocation6], %s2238_s1, %s2238_s1, %s2239_s17  }
  0x36   :  { %s2182_s12 = scalar_lea.hbm %s2753_s3, 256 }
  0x37   :  { %p2183_p10 = scmp.ne.s32.totalorder %s2753_s3, %s2182_s12  ;;  %p2186_p11 = scmp.lt.u32.totalorder %s2182_s12, %s2753_s3 }
  0x39   :  { %p2188_p12 = pnand %p2186_p11, %p2183_p10 }
  0x3b   :  { %2191 = shalt.err (!%p2188_p12)
}
  0x3c   :  { %s2192_s18 = scalar_lea.vmem %s2310_s23, 256  ;;  %p2197_p0 = scmp.lt.s32.totalorder %s2310_s23, %s2310_s23 }
  0x3d   :  { %p2193_p13 = scmp.ne.s32.totalorder %s2310_s23, %s2192_s18  ;;  %p2198_p1 = scmp.lt.s32.totalorder %s2192_s18, %s2192_s18 }
  0x3f   :  { %p2199_p2 = por %p2198_p1, %p2197_p0 }
  0x41   :  { %p2200_p3 = pnand %p2199_p2, %p2193_p13 }
  0x43   :  { %2203 = shalt.err (!%p2200_p3)
}
  0x44   :  { %61 = dma.hbm_to_vmem [thread:$0]  %s2753_s3, 256, %s2310_s23, [#allocation9], %s2238_s1, %s2238_s1, %s2239_s17  }
  0x45   :  { %2226 = dma.done.wait [#allocation3], 1024  }
  0x46   :  { %2227 = vsyncadd [#allocation3], 4294966272 }
  0x47   :  { %2228 = dma.done.wait [#allocation6], 640  }
  0x48   :  { %2229 = vsyncadd [#allocation6], 4294966656 }
  0x49   :  { %2230 = dma.done.wait [#allocation9], 256  }
  0x4a   :  { %2231 = vsyncadd [#allocation9], 4294967040  ;;  %v2242_v0 = vmov 1966171168   ;;  %v107_v2 = vlaneseq  ;;  %vm217_vm0 = vcmask 261120   ;;  %v213_v20 = vld [vmem:[#allocation7] sm:$0xff] }
  0x4b   :  { %v105_v1 = vunpack.c.l.s4 %v2242_v0  ;;  %v2350_v5 = vld [vmem:[#allocation5] sm:$0x1]  ;;  %v2352_v6 = vld [vmem:[#allocation5 + $0x1] sm:$0x1]  ;;  %v2354_v7 = vld [vmem:[#allocation5 + $0x2] sm:$0x1] }
  0x4c   :  { %v2348_v4 = vshrl.u32 %v107_v2, 7  ;;  %v2356_v8 = vld [vmem:[#allocation5 + $0x3] sm:$0x1]  ;;  %v2358_v9 = vld [vmem:[#allocation5 + $0x4] sm:$0x1]  ;;  %v84_v13 = vsub.f32 1.0, %v2350_v5 }
  0x4d   :  { %v106_v3 = vunpack.c.0.s8 %v105_v1  ;;  %v2360_v10 = vld [vmem:[#allocation5 + $0x5] sm:$0x1]  ;;  %v2362_v11 = vld [vmem:[#allocation5 + $0x6] sm:$0x1]  ;;  %v2364_v12 = vld [vmem:[#allocation5 + $0x7] sm:$0x1] }
  0x4e   :  { %v85_v14 = vsub.f32 1.0, %v2352_v6  ;;  %v86_v16 = vsub.f32 1.0, %v2354_v7  ;;  %v87_v17 = vsub.f32 1.0, %v2356_v8  ;;  %v88_v18 = vsub.f32 1.0, %v2358_v9  ;;  %v214_v21 = vld [vmem:[#allocation7 + $0x8] sm:$0xff]  ;;  %v215_v26 = vld [vmem:[#allocation7 + $0x10] sm:$0xff] }
  0x4f   :  { %v2369_v15 = vsub.s32 %v106_v3, %v2348_v4  ;;  %v89_v19 = vsub.f32 1.0, %v2360_v10  ;;  %v90_v22 = vsub.f32 1.0, %v2362_v11  ;;  %v91_v23 = vsub.f32 1.0, %v2364_v12  ;;  %v216_v27 = vld [vmem:[#allocation7 + $0x18] sm:$0xff]  ;;  %v211_v34 = vld [vmem:[#allocation2 + $0x30] sm:$0xff]  ;;  %v206_v41 = vld [vmem:[#allocation2 + $0x8] sm:$0xff] }
  0x50   :  { %v100_v24 = vcombine.low %v84_v13, %v85_v14  ;;  %v2059_v25 = vpack.c.bf16 %v214_v21, %v213_v20  ;;  %v205_v28 = vld [vmem:[#allocation2] sm:$0xff]  ;;  %v101_v29 = vcombine.low %v86_v16, %v87_v17  ;;  %v2063_v31 = vpack.c.bf16 %v216_v27, %v215_v26  ;;  %2049 = vmatprep.mubr.msk.f32.mxu1 %vm217_vm0, %v211_v34  ;;  %v212_v42 = vld [vmem:[#allocation2 + $0x38] sm:$0xff]  ;;  %v207_v44 = vld [vmem:[#allocation2 + $0x10] sm:$0xff]  ;;  %s2248_s17 = smov 96   ;;  %s2249_s20 = smov [#allocation10]  }
  0x51   :  { %v102_v30 = vcombine.low %v88_v18, %v89_v19  ;;  %2040 = vmatprep.mubr.msk.f32.mxu0 %vm217_vm0, %v205_v28  ;;  %v103_v32 = vcombine.low %v90_v22, %v91_v23  ;;  %vm150_vm1 = vcmask 64512   ;;  %v208_v46 = vld [vmem:[#allocation2 + $0x18] sm:$0xff]  ;;  %v209_v48 = vld [vmem:[#allocation2 + $0x20] sm:$0xff]  ;;  %v210_v49 = vld [vmem:[#allocation2 + $0x28] sm:$0xff]  ;;  %v2409_v52 = vsub.s32 0, %v2348_v4  ;;  %s1994_s21 = sshll.u32 %s2249_s20, 4  ;;  %s1995_s21 = int_to_ptr.vmem [resolvable:$true] %s1994_s21 }
  0x52   :  { %v110_v33 = vrot.slane %v100_v24, %v2369_v15  ;;  %2060 = vmatprep.subr.bf16.mxu0 %v2059_v25  ;;  %2070 = vmatprep.subr.bf16.mxu1 %v2059_v25  ;;  %v117_v35 = vrot.slane %v101_v29, %v2369_v15  ;;  %v2412_v53 = vsub.s32 1, %v2348_v4  ;;  %v2415_v54 = vsub.s32 2, %v2348_v4  ;;  %v490_v34 = vld [vmem:[#allocation8 + $0x8] sm:$0xff]  ;;  %s2204_s22 = scalar_lea.vmem %s1995_s21, 128  ;;  %p2209_p5 = scmp.lt.s32.totalorder %s1995_s21, %s1995_s21 }
  0x53   :  { %v124_v36 = vrot.slane %v102_v30, %v2369_v15  ;;  %2062 = vmatpush3.bf16.msra.mxu0 %v2059_v25  ;;  %2072 = vmatpush3.bf16.msra.mxu1 %v2059_v25  ;;  %v131_v37 = vrot.slane %v103_v32, %v2369_v15  ;;  %v2421_v59 = vsub.s32 3, %v2348_v4  ;;  %v2428_v62 = vsub.s32 4, %v2348_v4  ;;  %p2205_p4 = scmp.ne.s32.totalorder %s1995_s21, %s2204_s22  ;;  %p2210_p6 = scmp.lt.s32.totalorder %s2204_s22, %s2204_s22 }
  0x54   :  { %2064 = vmatprep.subr.bf16.mxu0 %v2063_v31  ;;  %2071 = vmatprep.subr.bf16.mxu1 %v2063_v31  ;;  %v132_v38 = vcombine.low %v110_v33, %v117_v35  ;;  %v2443_v21 = vsub.s32 5, %v2348_v4  ;;  %v2451_v26 = vsub.s32 6, %v2348_v4  ;;  %v2458_v29 = vsub.s32 7, %v2348_v4  ;;  %v489_v33 = vld [vmem:[#allocation8] sm:$0xff] }
  0x55   :  { %v133_v39 = vcombine.low %v124_v36, %v131_v37  ;;  %v2068_v35 = vpack.c.bf16 %v490_v34, %v489_v33  ;;  %v2243_v36 = vmov 0.0|0.0   ;;  %vm2244_vm2 = vmmov 0   ;;  %p2211_p7 = por %p2210_p6, %p2209_p5 }
  0x56   :  { %v140_v40 = vrot.slane %v132_v38, %v2369_v15  ;;  %v2245_v11 = vmov 0.0   ;;  %vm424_vm3 = vcmask 130048   ;;  %vm499_vm4 = vcmask 1041409  }
  0x57   :  { %2066 = vmatpush3.bf16.msra.mxu0 %v2063_v31  ;;  %2073 = vmatpush3.bf16.msra.mxu1 %v2063_v31  ;;  %v147_v43 = vrot.slane %v133_v39, %v2369_v15  ;;  %vm501_vm5 = vcmask 1042434   ;;  %vm503_vm6 = vcmask 1043459   ;;  %vm505_vm7 = vcmask 1044484   ;;  %p2212_p8 = pnand %p2211_p7, %p2205_p4 }
  0x58   :  { %2067 = vmatprep.subr.bf16.mxu1 %v2243_v36  ;;  %vm507_vm8 = vcmask 1045509   ;;  %vm509_vm9 = vcmask 1046534   ;;  %vm511_vm10 = vcmask 1047559   ;;  %vm743_vm11 = vcmp.gt.f32.partialorder %v2356_v8, 0.0 }
  0x59   :  { %v148_v45 = vcombine.low %v140_v40, %v147_v43  ;;  %vm741_vm12 = vcmp.gt.f32.partialorder %v2352_v6, 0.0  ;;  %vm742_vm13 = vcmp.gt.f32.partialorder %v2354_v7, 0.0  ;;  %vm745_vm15 = vcmp.gt.f32.partialorder %v2360_v10, 0.0  ;;  %v2113_v6 = vld [vmem:[#allocation5 + $0x4] sm:$0x1] }
  0x5a   :  { %2041 = vmatmul.mubr.msk.f32.vlgmr.msra.gmra.mrb[0].mxu0 %vm217_vm0, %v206_v41  ;;  %2050 = vmatmul.mubr.msk.f32.vlgmr.msra.gmra.mrb[0].mxu1 %vm217_vm0, %v212_v42 }
  0x5b   :  { %2043 = vmatprep.mubr.msk.f32.mxu0 %vm217_vm0, %v207_v44  ;;  %v151_v47 = vsel %vm150_vm1, %v148_v45, 0.0  ;;  %2069 = vmatpush3.bf16.msra.mxu1 %v2068_v35 }
  0x5c   :  { %152 = vadd.xlane.f32.xlu0 %v151_v47  ;;  %2056 = vmatprep.mubr.msk.f32.mxu1 %vm2244_vm2, %v2245_v11 }
  0x5e   :  { %2044 = vmatmul.mubr.msk.f32.gmra.mrb[2].mxu0 %vm217_vm0, %v208_v46 }
  0x5f   :  { %2046 = vmatprep.mubr.msk.f32.mxu0 %vm217_vm0, %v209_v48 }
  0x62   :  { %2047 = vmatmul.mubr.msk.f32.gmra.mrb[4].mxu0 %vm217_vm0, %v210_v49  ;;  %vm744_vm0 = vcmp.gt.f32.partialorder %v2113_v6, 0.0 }
  0xe9   :  { %v153_v50 = vpop.xlane.xlu0 %152 }
  0xea   :  { %v154_v51 = vmax.f32 %v153_v50, 1.0 }
  0xec   :  { %2092 = vrcp.f32 %v154_v51 }
  0xf6   :  { %v2093_v55 = vpop.eup %2092 }
  0xf7   :  { %v164_v56 = vrot.slane %v2093_v55, %v2412_v53  ;;  %v160_v57 = vrot.slane %v2093_v55, %v2409_v52  ;;  %v168_v58 = vrot.slane %v2093_v55, %v2415_v54  ;;  %v172_v3 = vrot.slane %v2093_v55, %v2421_v59 }
  0xf8   :  { %v176_v20 = vrot.slane %v2093_v55, %v2428_v62  ;;  %v180_v25 = vrot.slane %v2093_v55, %v2443_v21  ;;  %v184_v28 = vrot.slane %v2093_v55, %v2451_v26  ;;  %v188_v30 = vrot.slane %v2093_v55, %v2458_v29 }
  0xf9   :  { %v198_v60 = vmul.f32 %v164_v56, %v85_v14  ;;  %v197_v61 = vmul.f32 %v160_v57, %v84_v13  ;;  %v199_v1 = vmul.f32 %v168_v58, %v86_v16  ;;  %v347_v14 = vld [vmem:[%s2754_s4] sm:$0xff]  ;;  %v200_v13 = vmul.f32 %v172_v3, %v87_v17  ;;  %s2246_s4 = smov 112  }
  0xfa   :  { %v201_v24 = vmul.f32 %v176_v20, %v88_v18  ;;  %v202_v27 = vmul.f32 %v180_v25, %v89_v19  ;;  %v203_v18 = vmul.f32 %v184_v28, %v90_v22  ;;  %v204_v32 = vmul.f32 %v188_v30, %v91_v23 }
  0xfb   :  { %v370_v63 = vrot.slane %v198_v60, %v2409_v52  ;;  %v363_v0 = vrot.slane %v197_v61, %v2409_v52  ;;  %v377_v5 = vrot.slane %v199_v1, %v2409_v52  ;;  %v384_v16 = vrot.slane %v200_v13, %v2409_v52 }
  0xfc   :  { %v391_v17 = vrot.slane %v201_v24, %v2409_v52  ;;  %v398_v9 = vrot.slane %v202_v27, %v2409_v52  ;;  %v405_v31 = vrot.slane %v203_v18, %v2409_v52  ;;  %v412_v19 = vrot.slane %v204_v32, %v2409_v52 }
  0xfd   :  { %372 = vbcast.lane.b32.xlu1 %v370_v63, 256  ;;  %365 = vbcast.lane.b32.xlu0 %v363_v0, 256 }
 0x101   :  { %379 = vbcast.lane.b32.xlu1 %v377_v5, 256  ;;  %349 = vrot.lane.b32.xlu0 %v347_v14, %s2235_s28 }
 0x105   :  { %386 = vbcast.lane.b32.xlu1 %v384_v16, 256 }
 0x109   :  { %393 = vbcast.lane.b32.xlu1 %v391_v17, 256 }
 0x10d   :  { %400 = vbcast.lane.b32.xlu1 %v398_v9, 256 }
 0x111   :  { %407 = vbcast.lane.b32.xlu1 %v405_v31, 256 }
 0x115   :  { %414 = vbcast.lane.b32.xlu1 %v412_v19, 256 }
 0x12d   :  { %v2468_v22 = vpop.f32.mrb[0].mxu0  ;;  %v2470_v37 = vpop.f32.mrb[0].mxu1 }
 0x12e   :  { %v2472_v38 = vpop.f32.mrb[1].mxu0  ;;  %v2474_v12 = vpop.f32.mrb[1].mxu1 }
 0x131   :  { %v2476_v23 = vpop.f32.mrb[2].mxu0 }
 0x132   :  { %v2478_v39 = vpop.f32.mrb[3].mxu0 }
 0x135   :  { %v2480_v40 = vpop.f32.mrb[4].mxu0 }
 0x136   :  { %v2482_v41 = vpop.f32.mrb[5].mxu0 }
 0x16f   :  { %v373_v42 = vpop.permute.xlu1 %372  ;;  %v366_v43 = vpop.permute.xlu0 %365 }
 0x170   :  { %v417_v44 = vmul.f32 %v2468_v22, %v373_v42  ;;  %v416_v45 = vmul.f32 %v366_v43, %v2472_v38 }
 0x172   :  { %v432_v46 = vsel %vm424_vm3, %v417_v44, 0.0  ;;  %v425_v47 = vsel %vm424_vm3, %v416_v45, 0.0 }
 0x173   :  { %v433_v48 = vrot.slane %v432_v46, 4  ;;  %v426_v49 = vrot.slane %v425_v47, 4  ;;  %v380_v50 = vpop.permute.xlu1 %379  ;;  %v350_v51 = vpop.permute.xlu0 %349 }
 0x174   :  { %v418_v55 = vmul.f32 %v380_v50, %v2478_v39  ;;  %v353_v56 = vadd.f32 %v2468_v22, %v350_v51  ;;  %v352_v60 = vadd.f32 %v350_v51, %v2472_v38  ;;  %v355_v63 = vadd.f32 %v2476_v23, %v350_v51 }
 0x175   :  { %v434_v57 = vadd.f32 %v433_v48, %v432_v46  ;;  %v427_v58 = vadd.f32 %v426_v49, %v425_v47  ;;  %v354_v5 = vadd.f32 %v350_v51, %v2478_v39  ;;  %v357_v17 = vadd.f32 %v2480_v40, %v350_v51 }
 0x176   :  { %v439_v61 = vsel %vm424_vm3, %v418_v55, 0.0  ;;  %686 = vrot.lane.b32.xlu0 %v353_v56, %s2246_s4  ;;  %684 = vrot.lane.b32.xlu1 %v352_v60, %s2246_s4  ;;  %v356_v27 = vadd.f32 %v350_v51, %v2482_v41  ;;  %v359_v11 = vadd.f32 %v2470_v37, %v350_v51  ;;  %v358_v42 = vadd.f32 %v350_v51, %v2474_v12 }
 0x177   :  { %v435_v0 = vrot.slane %v434_v57, 2  ;;  %v428_v1 = vrot.slane %v427_v58, 2  ;;  %v440_v3 = vrot.slane %v439_v61, 4  ;;  %v387_v14 = vpop.permute.xlu1 %386 }
 0x178   :  { %v419_v13 = vmul.f32 %v2476_v23, %v387_v14 }
 0x179   :  { %v436_v20 = vadd.f32 %v435_v0, %v434_v57  ;;  %v429_v16 = vadd.f32 %v428_v1, %v427_v58  ;;  %v441_v24 = vadd.f32 %v440_v3, %v439_v61 }
 0x17a   :  { %v446_v25 = vsel %vm424_vm3, %v419_v13, 0.0  ;;  %690 = vrot.lane.b32.xlu0 %v355_v63, %s2246_s4  ;;  %688 = vrot.lane.b32.xlu1 %v354_v5, %s2246_s4 }
 0x17b   :  { %v437_v28 = vrot.slane %v436_v20, 1  ;;  %v430_v9 = vrot.slane %v429_v16, 1  ;;  %v442_v18 = vrot.slane %v441_v24, 2  ;;  %v447_v30 = vrot.slane %v446_v25, 4  ;;  %v394_v31 = vpop.permute.xlu1 %393 }
 0x17c   :  { %v420_v32 = vmul.f32 %v394_v31, %v2482_v41 }
 0x17d   :  { %v438_v19 = vadd.f32 %v437_v28, %v436_v20  ;;  %v431_v33 = vadd.f32 %v430_v9, %v429_v16  ;;  %v443_v34 = vadd.f32 %v442_v18, %v441_v24  ;;  %v448_v35 = vadd.f32 %v447_v30, %v446_v25 }
 0x17e   :  { %v453_v36 = vsel %vm424_vm3, %v420_v32, 0.0  ;;  %694 = vrot.lane.b32.xlu0 %v357_v17, %s2246_s4  ;;  %692 = vrot.lane.b32.xlu1 %v356_v27, %s2246_s4 }
 0x17f   :  { %v482_v43 = vmax.f32 %v438_v19, 0.0  ;;  %v481_v44 = vmax.f32 %v431_v33, 0.0  ;;  %v444_v45 = vrot.slane %v443_v34, 1  ;;  %v449_v46 = vrot.slane %v448_v35, 2  ;;  %v401_v47 = vpop.permute.xlu1 %400 }
 0x180   :  { %v454_v48 = vrot.slane %v453_v36, 4  ;;  %v421_v49 = vmul.f32 %v2480_v40, %v401_v47 }
 0x181   :  { %v500_v50 = vsel %vm499_vm4, %v482_v43, %v481_v44  ;;  %v445_v55 = vadd.f32 %v444_v45, %v443_v34  ;;  %v450_v56 = vadd.f32 %v449_v46, %v448_v35  ;;  %vm1980_vm4 = vcmask 57344  }
 0x182   :  { %v455_v57 = vadd.f32 %v454_v48, %v453_v36  ;;  %v460_v58 = vsel %vm424_vm3, %v421_v49, 0.0  ;;  %698 = vrot.lane.b32.xlu0 %v359_v11, %s2246_s4  ;;  %696 = vrot.lane.b32.xlu1 %v358_v42, %s2246_s4 }
 0x183   :  { %v483_v51 = vmax.f32 %v445_v55, 0.0  ;;  %v451_v60 = vrot.slane %v450_v56, 1  ;;  %v461_v61 = vrot.slane %v460_v58, 4  ;;  %v408_v63 = vpop.permute.xlu1 %407 }
 0x184   :  { %v456_v0 = vrot.slane %v455_v57, 2  ;;  %v422_v1 = vmul.f32 %v408_v63, %v2474_v12 }
 0x185   :  { %v502_v3 = vsel %vm501_vm5, %v483_v51, %v500_v50  ;;  %v452_v14 = vadd.f32 %v451_v60, %v450_v56  ;;  %v462_v5 = vadd.f32 %v461_v61, %v460_v58 }
 0x186   :  { %v457_v13 = vadd.f32 %v456_v0, %v455_v57  ;;  %v467_v20 = vsel %vm424_vm3, %v422_v1, 0.0 }
 0x187   :  { %v484_v16 = vmax.f32 %v452_v14, 0.0  ;;  %v463_v24 = vrot.slane %v462_v5, 2  ;;  %v468_v25 = vrot.slane %v467_v20, 4  ;;  %v415_v17 = vpop.permute.xlu1 %414 }
 0x188   :  { %v458_v27 = vrot.slane %v457_v13, 1  ;;  %v423_v28 = vmul.f32 %v2470_v37, %v415_v17 }
 0x189   :  { %v504_v9 = vsel %vm503_vm6, %v484_v16, %v502_v3  ;;  %v464_v18 = vadd.f32 %v463_v24, %v462_v5  ;;  %v469_v30 = vadd.f32 %v468_v25, %v467_v20 }
 0x18a   :  { %v459_v31 = vadd.f32 %v458_v27, %v457_v13  ;;  %v474_v32 = vsel %vm424_vm3, %v423_v28, 0.0 }
 0x18b   :  { %v465_v19 = vrot.slane %v464_v18, 1  ;;  %v470_v33 = vrot.slane %v469_v30, 2  ;;  %v475_v34 = vrot.slane %v474_v32, 4 }
 0x18c   :  { %v485_v35 = vmax.f32 %v459_v31, 0.0 }
 0x18d   :  { %v466_v36 = vadd.f32 %v465_v19, %v464_v18  ;;  %v471_v11 = vadd.f32 %v470_v33, %v469_v30  ;;  %v476_v42 = vadd.f32 %v475_v34, %v474_v32 }
 0x18e   :  { %v506_v43 = vsel %vm505_vm7, %v485_v35, %v504_v9 }
 0x18f   :  { %v486_v44 = vmax.f32 %v466_v36, 0.0  ;;  %v472_v45 = vrot.slane %v471_v11, 1  ;;  %v477_v46 = vrot.slane %v476_v42, 2 }
 0x191   :  { %v473_v47 = vadd.f32 %v472_v45, %v471_v11  ;;  %v478_v48 = vadd.f32 %v477_v46, %v476_v42  ;;  %v508_v49 = vsel %vm507_vm8, %v486_v44, %v506_v43 }
 0x193   :  { %v487_v50 = vmax.f32 %v473_v47, 0.0  ;;  %v479_v55 = vrot.slane %v478_v48, 1 }
 0x195   :  { %v480_v56 = vadd.f32 %v479_v55, %v478_v48  ;;  %v510_v57 = vsel %vm509_vm9, %v487_v50, %v508_v49 }
 0x197   :  { %v488_v58 = vmax.f32 %v480_v56, 0.0 }
 0x199   :  { %v512_v51 = vsel %vm511_vm10, %v488_v58, %v510_v57 }
 0x19a   :  { %2057 = vmatmul.mubr.msk.f32.vlgmr.msra.gmra.mrb[2].mxu1 %vm424_vm3, %v512_v51 }
 0x1e8   :  { %v687_v60 = vpop.permute.xlu0 %686  ;;  %v685_v1 = vpop.permute.xlu1 %684 }
 0x1ec   :  { %v691_v16 = vpop.permute.xlu0 %690  ;;  %v689_v28 = vpop.permute.xlu1 %688 }
 0x1f0   :  { %v695_v36 = vpop.permute.xlu0 %694  ;;  %v693_v48 = vpop.permute.xlu1 %692 }
 0x1f4   :  { %v699_v51 = vpop.permute.xlu0 %698 }
 0x26d   :  { %v581_v61 = vpop.f32.mrb[2].mxu1 }
 0x26e   :  { %v585_v63 = vmul.f32 0.25, %v581_v61  ;;  %v2058_v0 = vpop.f32.mrb[3].mxu1 }
 0x270   :  { %v587_v3 = vcombine.high %v585_v63, %v585_v63  ;;  %v594_v14 = vrot.slane %v585_v63, %v2369_v15  ;;  %v697_v63 = vpop.permute.xlu1 %696 }
 0x272   :  { %v601_v5 = vrot.slane %v587_v3, %v2369_v15  ;;  %v602_v13 = vcombine.high %v594_v14, %v594_v14  ;;  %v610_v20 = vrot.slane %v594_v14, %v2369_v15 }
 0x274   :  { %v603_v24 = vcombine.high %v601_v5, %v601_v5  ;;  %v639_v25 = vrot.slane %v610_v20, %v2409_v52  ;;  %v624_v17 = vrot.slane %v602_v13, %v2369_v15  ;;  %v632_v27 = vcombine.high %v610_v20, %v610_v20 }
 0x275   :  { %v617_v9 = vrot.slane %v601_v5, %v2369_v15  ;;  %v2247_v5 = vmov 0  }
 0x276   :  { %v708_v18 = vmul.f32 %v685_v1, %v639_v25  ;;  %v643_v30 = vrot.slane %v624_v17, %v2409_v52  ;;  %v634_v31 = vcombine.high %v624_v17, %v624_v17  ;;  %v647_v32 = vrot.slane %v632_v27, %v2409_v52  ;;  %2090 = vset.pattern.permute.xlu0 %v2247_v5 }
 0x277   :  { %v631_v19 = vrot.slane %v603_v24, %v2369_v15  ;;  %v655_v42 = vrot.slane %v617_v9, %v2409_v52  ;;  %v633_v47 = vcombine.high %v617_v9, %v617_v9  ;;  %2091 = vset.pattern.permute.xlu1 %v2247_v5 }
 0x278   :  { %v716_v33 = vsel %vm424_vm3, %v708_v18, 0.0  ;;  %v709_v34 = vmul.f32 %v687_v60, %v643_v30  ;;  %v651_v35 = vrot.slane %v634_v31, %v2409_v52  ;;  %v710_v46 = vmul.f32 %v689_v28, %v647_v32 }
 0x279   :  { %717 = vadd.xlane.f32.xlu1 %v716_v33  ;;  %v659_v11 = vrot.slane %v631_v19, %v2409_v52  ;;  %v635_v43 = vcombine.high %v631_v19, %v631_v19  ;;  %v712_v57 = vmul.f32 %v693_v48, %v655_v42  ;;  %v663_v58 = vrot.slane %v633_v47, %v2409_v52 }
 0x27a   :  { %v719_v44 = vsel %vm424_vm3, %v709_v34, 0.0  ;;  %v711_v45 = vmul.f32 %v691_v16, %v651_v35  ;;  %v722_v56 = vsel %vm424_vm3, %v710_v46, 0.0 }
 0x27b   :  { %720 = vadd.xlane.f32.xlu0 %v719_v44  ;;  %v713_v50 = vmul.f32 %v695_v36, %v659_v11  ;;  %v667_v55 = vrot.slane %v635_v43, %v2409_v52  ;;  %v728_v0 = vsel %vm424_vm3, %v712_v57, 0.0  ;;  %v714_v1 = vmul.f32 %v697_v63, %v663_v58 }
 0x27c   :  { %v725_v49 = vsel %vm424_vm3, %v711_v45, 0.0 }
 0x27d   :  { %726 = vadd.xlane.f32.xlu1 %v725_v49  ;;  %v731_v60 = vsel %vm424_vm3, %v713_v50, 0.0  ;;  %v715_v61 = vmul.f32 %v699_v51, %v667_v55  ;;  %v734_v14 = vsel %vm424_vm3, %v714_v1, 0.0 }
 0x27f   :  { %723 = vadd.xlane.f32.xlu0 %v722_v56  ;;  %v737_v3 = vsel %vm424_vm3, %v715_v61, 0.0 }
 0x281   :  { %732 = vadd.xlane.f32.xlu1 %v731_v60 }
 0x283   :  { %729 = vadd.xlane.f32.xlu0 %v728_v0 }
 0x285   :  { %738 = vadd.xlane.f32.xlu1 %v737_v3 }
 0x287   :  { %735 = vadd.xlane.f32.xlu0 %v734_v14 }
 0x306   :  { %v718_v13 = vpop.xlane.xlu1 %717 }
 0x307   :  { %v759_v20 = vrot.slane %v718_v13, %v2409_v52  ;;  %v763_v16 = vrot.slane %v718_v13, %v2412_v53  ;;  %v767_v24 = vrot.slane %v718_v13, %v2415_v54  ;;  %v771_v25 = vrot.slane %v718_v13, %v2421_v59 }
 0x308   :  { %v721_v17 = vpop.xlane.xlu0 %720  ;;  %v775_v27 = vrot.slane %v718_v13, %v2428_v62  ;;  %v779_v28 = vrot.slane %v718_v13, %v2443_v21  ;;  %v783_v9 = vrot.slane %v718_v13, %v2451_v26  ;;  %v787_v18 = vrot.slane %v718_v13, %v2458_v29 }
 0x309   :  { %v1012_v30 = vcombine.low %v759_v20, %v763_v16  ;;  %v1013_v31 = vcombine.low %v767_v24, %v771_v25  ;;  %v791_v32 = vrot.slane %v721_v17, %v2409_v52  ;;  %v795_v19 = vrot.slane %v721_v17, %v2412_v53 }
 0x30a   :  { %v1014_v33 = vcombine.low %v775_v27, %v779_v28  ;;  %v1015_v34 = vcombine.low %v783_v9, %v787_v18  ;;  %v799_v35 = vrot.slane %v721_v17, %v2415_v54  ;;  %v803_v36 = vrot.slane %v721_v17, %v2421_v59 }
 0x30b   :  { %v1022_v11 = vrot.slane %v1012_v30, %v2369_v15  ;;  %v1029_v42 = vrot.slane %v1013_v31, %v2369_v15  ;;  %v807_v43 = vrot.slane %v721_v17, %v2428_v62  ;;  %v811_v44 = vrot.slane %v721_v17, %v2443_v21 }
 0x30c   :  { %v724_v45 = vpop.xlane.xlu0 %723  ;;  %v1036_v46 = vrot.slane %v1014_v33, %v2369_v15  ;;  %v1043_v47 = vrot.slane %v1015_v34, %v2369_v15  ;;  %v815_v48 = vrot.slane %v721_v17, %v2451_v26  ;;  %v819_v49 = vrot.slane %v721_v17, %v2458_v29 }
 0x30d   :  { %v1044_v50 = vcombine.low %v1022_v11, %v1029_v42  ;;  %v1061_v55 = vcombine.low %v791_v32, %v795_v19  ;;  %v1062_v56 = vcombine.low %v799_v35, %v803_v36  ;;  %v1063_v57 = vcombine.low %v807_v43, %v811_v44  ;;  %v727_v42 = vpop.xlane.xlu1 %726 }
 0x30e   :  { %v1045_v58 = vcombine.low %v1036_v46, %v1043_v47  ;;  %v1064_v51 = vcombine.low %v815_v48, %v819_v49  ;;  %v823_v60 = vrot.slane %v724_v45, %v2409_v52  ;;  %v827_v61 = vrot.slane %v724_v45, %v2412_v53 }
 0x30f   :  { %v1052_v63 = vrot.slane %v1044_v50, %v2369_v15  ;;  %v1071_v0 = vrot.slane %v1061_v55, %v2369_v15  ;;  %v1078_v1 = vrot.slane %v1062_v56, %v2369_v15  ;;  %v1085_v3 = vrot.slane %v1063_v57, %v2369_v15 }
 0x310   :  { %v730_v14 = vpop.xlane.xlu0 %729  ;;  %v1059_v5 = vrot.slane %v1045_v58, %v2369_v15  ;;  %v1092_v13 = vrot.slane %v1064_v51, %v2369_v15  ;;  %v831_v20 = vrot.slane %v724_v45, %v2415_v54  ;;  %v835_v16 = vrot.slane %v724_v45, %v2421_v59 }
 0x311   :  { %v1093_v24 = vcombine.low %v1071_v0, %v1078_v1  ;;  %v839_v25 = vrot.slane %v724_v45, %v2428_v62  ;;  %v843_v17 = vrot.slane %v724_v45, %v2443_v21  ;;  %v847_v27 = vrot.slane %v724_v45, %v2451_v26 }
 0x312   :  { %v1060_v28 = vcombine.low %v1052_v63, %v1059_v5  ;;  %v1094_v9 = vcombine.low %v1085_v3, %v1092_v13  ;;  %v851_v18 = vrot.slane %v724_v45, %v2458_v29  ;;  %v1110_v30 = vcombine.low %v823_v60, %v827_v61 }
 0x313   :  { %v1101_v31 = vrot.slane %v1093_v24, %v2369_v15  ;;  %v1111_v32 = vcombine.low %v831_v20, %v835_v16  ;;  %v1112_v19 = vcombine.low %v839_v25, %v843_v17  ;;  %v887_v33 = vrot.slane %v730_v14, %v2409_v52  ;;  %v733_v24 = vpop.xlane.xlu1 %732 }
 0x314   :  { %1405 = vperm.xlu0 %2090, %v1060_v28   ;;  %v1108_v34 = vrot.slane %v1094_v9, %v2369_v15  ;;  %v1113_v35 = vcombine.low %v847_v27, %v851_v18  ;;  %v1120_v36 = vrot.slane %v1110_v30, %v2369_v15  ;;  %v891_v11 = vrot.slane %v730_v14, %v2412_v53 }
 0x315   :  { %v1127_v43 = vrot.slane %v1111_v32, %v2369_v15  ;;  %v1134_v44 = vrot.slane %v1112_v19, %v2369_v15  ;;  %v895_v45 = vrot.slane %v730_v14, %v2415_v54  ;;  %v899_v46 = vrot.slane %v730_v14, %v2421_v59 }
 0x316   :  { %v1109_v47 = vcombine.low %v1101_v31, %v1108_v34  ;;  %v1141_v48 = vrot.slane %v1113_v35, %v2369_v15  ;;  %v903_v49 = vrot.slane %v730_v14, %v2428_v62  ;;  %v907_v50 = vrot.slane %v730_v14, %v2443_v21 }
 0x317   :  { %v1142_v55 = vcombine.low %v1120_v36, %v1127_v43  ;;  %v911_v56 = vrot.slane %v730_v14, %v2451_v26  ;;  %v915_v57 = vrot.slane %v730_v14, %v2458_v29  ;;  %v1208_v58 = vcombine.low %v887_v33, %v891_v11 }
 0x318   :  { %1408 = vperm.xlu1 %2091, %v1109_v47   ;;  %v1143_v51 = vcombine.low %v1134_v44, %v1141_v48  ;;  %v1209_v60 = vcombine.low %v895_v45, %v899_v46  ;;  %v1210_v61 = vcombine.low %v903_v49, %v907_v50  ;;  %v855_v63 = vrot.slane %v727_v42, %v2409_v52  ;;  %v736_v47 = vpop.xlane.xlu0 %735 }
 0x319   :  { %v1150_v0 = vrot.slane %v1142_v55, %v2369_v15  ;;  %v1211_v1 = vcombine.low %v911_v56, %v915_v57  ;;  %v1218_v3 = vrot.slane %v1208_v58, %v2369_v15  ;;  %v859_v5 = vrot.slane %v727_v42, %v2412_v53 }
 0x31a   :  { %v1157_v13 = vrot.slane %v1143_v51, %v2369_v15  ;;  %v1225_v20 = vrot.slane %v1209_v60, %v2369_v15  ;;  %v1232_v14 = vrot.slane %v1210_v61, %v2369_v15  ;;  %v863_v16 = vrot.slane %v727_v42, %v2415_v54 }
 0x31b   :  { %v1239_v25 = vrot.slane %v1211_v1, %v2369_v15  ;;  %v867_v17 = vrot.slane %v727_v42, %v2421_v59  ;;  %v871_v27 = vrot.slane %v727_v42, %v2428_v62  ;;  %v875_v28 = vrot.slane %v727_v42, %v2443_v21 }
 0x31c   :  { %v1158_v9 = vcombine.low %v1150_v0, %v1157_v13  ;;  %v1240_v18 = vcombine.low %v1218_v3, %v1225_v20  ;;  %v879_v30 = vrot.slane %v727_v42, %v2451_v26  ;;  %v883_v31 = vrot.slane %v727_v42, %v2458_v29 }
 0x31d   :  { %v1241_v32 = vcombine.low %v1232_v14, %v1239_v25  ;;  %v1159_v19 = vcombine.low %v855_v63, %v859_v5  ;;  %v1160_v33 = vcombine.low %v863_v16, %v867_v17  ;;  %v1161_v34 = vcombine.low %v871_v27, %v875_v28  ;;  %v739_v17 = vpop.xlane.xlu1 %738 }
 0x31e   :  { %1411 = vperm.xlu1 %2091, %v1158_v9   ;;  %v1248_v35 = vrot.slane %v1240_v18, %v2369_v15  ;;  %v1162_v36 = vcombine.low %v879_v30, %v883_v31  ;;  %v919_v11 = vrot.slane %v733_v24, %v2409_v52  ;;  %v923_v43 = vrot.slane %v733_v24, %v2412_v53 }
 0x31f   :  { %v1255_v44 = vrot.slane %v1241_v32, %v2369_v15  ;;  %v1169_v45 = vrot.slane %v1159_v19, %v2369_v15  ;;  %v1176_v46 = vrot.slane %v1160_v33, %v2369_v15  ;;  %v1183_v42 = vrot.slane %v1161_v34, %v2369_v15 }
 0x320   :  { %v1190_v48 = vrot.slane %v1162_v36, %v2369_v15  ;;  %v927_v49 = vrot.slane %v733_v24, %v2415_v54  ;;  %v931_v50 = vrot.slane %v733_v24, %v2421_v59  ;;  %v935_v55 = vrot.slane %v733_v24, %v2428_v62 }
 0x321   :  { %v1256_v56 = vcombine.low %v1248_v35, %v1255_v44  ;;  %v1191_v57 = vcombine.low %v1169_v45, %v1176_v46  ;;  %v939_v58 = vrot.slane %v733_v24, %v2443_v21  ;;  %v943_v51 = vrot.slane %v733_v24, %v2451_v26 }
 0x322   :  { %v1192_v60 = vcombine.low %v1183_v42, %v1190_v48  ;;  %v947_v61 = vrot.slane %v733_v24, %v2458_v29  ;;  %v1257_v63 = vcombine.low %v919_v11, %v923_v43  ;;  %v1258_v0 = vcombine.low %v927_v49, %v931_v50 }
 0x323   :  { %1417 = vperm.xlu1 %2091, %v1256_v56   ;;  %v1199_v1 = vrot.slane %v1191_v57, %v2369_v15  ;;  %v1259_v3 = vcombine.low %v935_v55, %v939_v58  ;;  %v951_v5 = vrot.slane %v736_v47, %v2409_v52  ;;  %v955_v13 = vrot.slane %v736_v47, %v2412_v53 }
 0x324   :  { %v1206_v20 = vrot.slane %v1192_v60, %v2369_v15  ;;  %v1260_v14 = vcombine.low %v943_v51, %v947_v61  ;;  %v1267_v16 = vrot.slane %v1257_v63, %v2369_v15  ;;  %v1274_v25 = vrot.slane %v1258_v0, %v2369_v15 }
 0x325   :  { %v1281_v24 = vrot.slane %v1259_v3, %v2369_v15  ;;  %v959_v27 = vrot.slane %v736_v47, %v2415_v54  ;;  %v963_v28 = vrot.slane %v736_v47, %v2421_v59  ;;  %v967_v9 = vrot.slane %v736_v47, %v2428_v62 }
 0x326   :  { %v1207_v18 = vcombine.low %v1199_v1, %v1206_v20  ;;  %v1288_v30 = vrot.slane %v1260_v14, %v2369_v15  ;;  %v1289_v31 = vcombine.low %v1267_v16, %v1274_v25  ;;  %v971_v32 = vrot.slane %v736_v47, %v2443_v21 }
 0x327   :  { %v975_v19 = vrot.slane %v736_v47, %v2451_v26  ;;  %v979_v33 = vrot.slane %v736_v47, %v2458_v29  ;;  %v1306_v34 = vcombine.low %v951_v5, %v955_v13  ;;  %v1307_v35 = vcombine.low %v959_v27, %v963_v28 }
 0x328   :  { %1414 = vperm.xlu1 %2091, %v1207_v18   ;;  %v1290_v36 = vcombine.low %v1281_v24, %v1288_v30  ;;  %v1297_v11 = vrot.slane %v1289_v31, %v2369_v15  ;;  %v1308_v43 = vcombine.low %v967_v9, %v971_v32  ;;  %v983_v44 = vrot.slane %v739_v17, %v2409_v52 }
 0x329   :  { %v1309_v45 = vcombine.low %v975_v19, %v979_v33  ;;  %v1316_v46 = vrot.slane %v1306_v34, %v2369_v15  ;;  %v1323_v42 = vrot.slane %v1307_v35, %v2369_v15  ;;  %v987_v48 = vrot.slane %v739_v17, %v2412_v53 }
 0x32a   :  { %v1304_v49 = vrot.slane %v1290_v36, %v2369_v15  ;;  %v1330_v47 = vrot.slane %v1308_v43, %v2369_v15  ;;  %v991_v50 = vrot.slane %v739_v17, %v2415_v54  ;;  %v995_v55 = vrot.slane %v739_v17, %v2421_v59 }
 0x32b   :  { %v1337_v56 = vrot.slane %v1309_v45, %v2369_v15  ;;  %v1338_v57 = vcombine.low %v1316_v46, %v1323_v42  ;;  %v999_v58 = vrot.slane %v739_v17, %v2428_v62  ;;  %v1003_v51 = vrot.slane %v739_v17, %v2443_v21 }
 0x32c   :  { %v1305_v60 = vcombine.low %v1297_v11, %v1304_v49  ;;  %v1007_v61 = vrot.slane %v739_v17, %v2451_v26  ;;  %v1011_v63 = vrot.slane %v739_v17, %v2458_v29  ;;  %v1355_v0 = vcombine.low %v983_v44, %v987_v48 }
 0x32d   :  { %v1339_v1 = vcombine.low %v1330_v47, %v1337_v56  ;;  %v1346_v3 = vrot.slane %v1338_v57, %v2369_v15  ;;  %v1356_v5 = vcombine.low %v991_v50, %v995_v55  ;;  %v1357_v13 = vcombine.low %v999_v58, %v1003_v51 }
 0x32e   :  { %1420 = vperm.xlu1 %2091, %v1305_v60   ;;  %v1358_v20 = vcombine.low %v1007_v61, %v1011_v63  ;;  %v1365_v14 = vrot.slane %v1355_v0, %v2369_v15  ;;  %v1429_v34 = vand.u32 127, %v107_v2 }
 0x32f   :  { %v1353_v16 = vrot.slane %v1339_v1, %v2369_v15  ;;  %v1372_v25 = vrot.slane %v1356_v5, %v2369_v15  ;;  %v1379_v24 = vrot.slane %v1357_v13, %v2369_v15  ;;  %v2112_v5 = vld [vmem:[#allocation5] sm:$0x1] }
 0x330   :  { %v1386_v27 = vrot.slane %v1358_v20, %v2369_v15  ;;  %v1432_v36 = vsub.s32 %v1429_v34, %v2348_v4  ;;  %vm740_vm14 = vcmp.gt.f32.partialorder %v2112_v5, 0.0 }
 0x331   :  { %v1354_v28 = vcombine.low %v1346_v3, %v1353_v16  ;;  %v1387_v17 = vcombine.low %v1365_v14, %v1372_v25 }
 0x332   :  { %v1388_v9 = vcombine.low %v1379_v24, %v1386_v27 }
 0x333   :  { %1423 = vperm.xlu1 %2091, %v1354_v28   ;;  %v1395_v18 = vrot.slane %v1387_v17, %v2369_v15 }
 0x334   :  { %v1402_v30 = vrot.slane %v1388_v9, %v2369_v15  ;;  %v2114_v9 = vld [vmem:[#allocation5 + $0x6] sm:$0x1] }
 0x335   :  { %vm746_vm2 = vcmp.gt.f32.partialorder %v2114_v9, 0.0 }
 0x336   :  { %v1403_v31 = vcombine.low %v1395_v18, %v1402_v30  ;;  %v2115_v18 = vld [vmem:[#allocation5 + $0x7] sm:$0x1] }
 0x337   :  { %vm747_vm3 = vcmp.gt.f32.partialorder %v2115_v18, 0.0 }
 0x338   :  { %1426 = vperm.xlu1 %2091, %v1403_v31  }
 0x393   :  { %v1406_v43 = vpop.permute.xlu0 %1405 }
 0x394   :  { %v1433_v42 = vrot.slane %v1406_v43, %v1432_v36 }
 0x396   :  { %v1468_v56 = vrot.slane %v1433_v42, %v2369_v15 }
 0x397   :  { %v1409_v32 = vpop.permute.xlu1 %1408 }
 0x398   :  { %v1437_v44 = vrot.slane %v1409_v32, %v1432_v36  ;;  %v1475_v63 = vrot.slane %v1468_v56, %v2369_v15 }
 0x39a   :  { %v1482_v47 = vrot.slane %v1437_v44, %v2369_v15  ;;  %v1582_v25 = vsel %vm740_vm14, -3.4028235e+38, %v1475_v63 }
 0x39c   :  { %v1489_v51 = vrot.slane %v1482_v47, %v2369_v15 }
 0x39d   :  { %v1412_v19 = vpop.permute.xlu1 %1411 }
 0x39e   :  { %v1441_v45 = vrot.slane %v1412_v19, %v1432_v36  ;;  %v1583_v13 = vsel %vm741_vm12, -3.4028235e+38, %v1489_v51 }
 0x39f   :  { %v1598_v17 = vcombine.low %v1582_v25, %v1583_v13 }
 0x3a0   :  { %v1496_v50 = vrot.slane %v1441_v45, %v2369_v15 }
 0x3a2   :  { %v1418_v33 = vpop.permute.xlu1 %1417  ;;  %v1503_v60 = vrot.slane %v1496_v50, %v2369_v15 }
 0x3a3   :  { %v1449_v55 = vrot.slane %v1418_v33, %v1432_v36 }
 0x3a4   :  { %v1584_v20 = vsel %vm742_vm13, -3.4028235e+38, %v1503_v60 }
 0x3a5   :  { %v1524_v61 = vrot.slane %v1449_v55, %v2369_v15 }
 0x3a7   :  { %v1415_v35 = vpop.permute.xlu1 %1414  ;;  %v1531_v14 = vrot.slane %v1524_v61, %v2369_v15 }
 0x3a8   :  { %v1445_v11 = vrot.slane %v1415_v35, %v1432_v36  ;;  %v1608_v35 = vrot.slane %v1598_v17, %v2369_v15 }
 0x3a9   :  { %v1586_v10 = vsel %vm744_vm0, -3.4028235e+38, %v1531_v14 }
 0x3aa   :  { %v1510_v48 = vrot.slane %v1445_v11, %v2369_v15 }
 0x3ac   :  { %v1517_v2 = vrot.slane %v1510_v48, %v2369_v15 }
 0x3ad   :  { %v1421_v46 = vpop.permute.xlu1 %1420 }
 0x3ae   :  { %v1453_v49 = vrot.slane %v1421_v46, %v1432_v36  ;;  %v1585_v0 = vsel %vm743_vm11, -3.4028235e+38, %v1517_v2 }
 0x3af   :  { %v1599_v7 = vcombine.low %v1584_v20, %v1585_v0 }
 0x3b0   :  { %v1538_v4 = vrot.slane %v1453_v49, %v2369_v15 }
 0x3b1   :  { %v1615_v32 = vrot.slane %v1599_v7, %v2369_v15 }
 0x3b2   :  { %v1424_v57 = vpop.permute.xlu1 %1423  ;;  %v1545_v1 = vrot.slane %v1538_v4, %v2369_v15 }
 0x3b3   :  { %v1457_v58 = vrot.slane %v1424_v57, %v1432_v36  ;;  %v1630_v43 = vcombine.low %v1608_v35, %v1615_v32 }
 0x3b4   :  { %v1587_v24 = vsel %vm745_vm15, -3.4028235e+38, %v1545_v1 }
 0x3b5   :  { %v1552_v3 = vrot.slane %v1457_v58, %v2369_v15  ;;  %v1600_v31 = vcombine.low %v1586_v10, %v1587_v24  ;;  %v1638_v45 = vrot.slane %v1630_v43, %v2369_v15 }
 0x3b7   :  { %v1427_v8 = vpop.permute.xlu1 %1426  ;;  %v1559_v27 = vrot.slane %v1552_v3, %v2369_v15 }
 0x3b8   :  { %v1461_v16 = vrot.slane %v1427_v8, %v1432_v36  ;;  %v1622_v36 = vrot.slane %v1600_v31, %v2369_v15 }
 0x3b9   :  { %v1588_v19 = vsel %vm746_vm2, -3.4028235e+38, %v1559_v27 }
 0x3ba   :  { %v1566_v28 = vrot.slane %v1461_v16, %v2369_v15 }
 0x3bc   :  { %v1573_v30 = vrot.slane %v1566_v28, %v2369_v15 }
 0x3be   :  { %v1589_v33 = vsel %vm747_vm3, -3.4028235e+38, %v1573_v30 }
 0x3bf   :  { %v1601_v34 = vcombine.low %v1588_v19, %v1589_v33 }
 0x3c1   :  { %v1629_v11 = vrot.slane %v1601_v34, %v2369_v15 }
 0x3c3   :  { %v1631_v44 = vcombine.low %v1622_v36, %v1629_v11 }
 0x3c5   :  { %v1645_v46 = vrot.slane %v1631_v44, %v2369_v15 }
 0x3c7   :  { %v1646_v42 = vcombine.low %v1638_v45, %v1645_v46 }
 0x3c9   :  { %v1648_v48 = vsel %vm150_vm1, %v1646_v42, -inf }
 0x3ca   :  { %1649 = vmax.xlane.f32.xlu0 %v1648_v48 }
 0x457   :  { %v1650_v49 = vpop.xlane.xlu0 %1649 }
 0x458   :  { %v1655_v47 = vrot.slane %v1650_v49, %v2409_v52  ;;  %v1659_v50 = vrot.slane %v1650_v49, %v2412_v53  ;;  %v1663_v55 = vrot.slane %v1650_v49, %v2415_v54  ;;  %v1667_v56 = vrot.slane %v1650_v49, %v2421_v59 }
 0x459   :  { %v1671_v2 = vrot.slane %v1650_v49, %v2428_v62  ;;  %v1675_v4 = vrot.slane %v1650_v49, %v2443_v21  ;;  %v1679_v57 = vrot.slane %v1650_v49, %v2451_v26  ;;  %v1683_v58 = vrot.slane %v1650_v49, %v2458_v29 }
 0x45a   :  { %v1692_v51 = vsub.f32 %v1582_v25, %v1655_v47  ;;  %v1693_v60 = vsub.f32 %v1583_v13, %v1659_v50  ;;  %v1694_v61 = vsub.f32 %v1584_v20, %v1663_v55  ;;  %v1695_v63 = vsub.f32 %v1585_v0, %v1667_v56 }
 0x45b   :  { %v1696_v1 = vsub.f32 %v1586_v10, %v1671_v2  ;;  %v1697_v3 = vsub.f32 %v1587_v24, %v1675_v4  ;;  %v1698_v5 = vsub.f32 %v1588_v19, %v1679_v57  ;;  %v1699_v6 = vsub.f32 %v1589_v33, %v1683_v58 }
 0x45c   :  { %v1700_v8 = vmul.f32 1.442695, %v1692_v51  ;;  %v1702_v14 = vmul.f32 1.442695, %v1693_v60  ;;  %v1704_v16 = vmul.f32 1.442695, %v1694_v61 }
 0x45d   :  { %v1706_v7 = vmul.f32 1.442695, %v1695_v63  ;;  %v1708_v27 = vmul.f32 1.442695, %v1696_v1  ;;  %v1710_v28 = vmul.f32 1.442695, %v1697_v3 }
 0x45e   :  { %2094 = vpow2.f32 %v1700_v8  ;;  %v1712_v17 = vmul.f32 1.442695, %v1698_v5  ;;  %v1714_v9 = vmul.f32 1.442695, %v1699_v6 }
 0x45f   :  { %2096 = vpow2.f32 %v1702_v14 }
 0x460   :  { %2098 = vpow2.f32 %v1704_v16 }
 0x461   :  { %2100 = vpow2.f32 %v1706_v7 }
 0x462   :  { %2102 = vpow2.f32 %v1708_v27 }
 0x463   :  { %2104 = vpow2.f32 %v1710_v28 }
 0x464   :  { %2106 = vpow2.f32 %v1712_v17 }
 0x465   :  { %2108 = vpow2.f32 %v1714_v9 }
 0x468   :  { %v2095_v0 = vpop.eup %2094 }
 0x469   :  { %v2097_v13 = vpop.eup %2096 }
 0x46a   :  { %v2099_v20 = vpop.eup %2098  ;;  %v1724_v25 = vcombine.low %v2095_v0, %v2097_v13 }
 0x46b   :  { %v2101_v24 = vpop.eup %2100 }
 0x46c   :  { %v2103_v18 = vpop.eup %2102  ;;  %v1725_v10 = vcombine.low %v2099_v20, %v2101_v24  ;;  %v1734_v30 = vrot.slane %v1724_v25, %v2369_v15 }
 0x46d   :  { %v2105_v31 = vpop.eup %2104 }
 0x46e   :  { %v2107_v32 = vpop.eup %2106  ;;  %v1726_v19 = vcombine.low %v2103_v18, %v2105_v31  ;;  %v1741_v33 = vrot.slane %v1725_v10, %v2369_v15 }
 0x46f   :  { %v2109_v34 = vpop.eup %2108 }
 0x470   :  { %v1727_v35 = vcombine.low %v2107_v32, %v2109_v34  ;;  %v1748_v36 = vrot.slane %v1726_v19, %v2369_v15  ;;  %v1756_v11 = vcombine.low %v1734_v30, %v1741_v33 }
 0x472   :  { %v1755_v43 = vrot.slane %v1727_v35, %v2369_v15  ;;  %v1764_v45 = vrot.slane %v1756_v11, %v2369_v15 }
 0x474   :  { %v1757_v44 = vcombine.low %v1748_v36, %v1755_v43 }
 0x476   :  { %v1771_v46 = vrot.slane %v1757_v44, %v2369_v15 }
 0x478   :  { %v1772_v42 = vcombine.low %v1764_v45, %v1771_v46 }
 0x47a   :  { %v1774_v48 = vsel %vm150_vm1, %v1772_v42, 0.0  ;;  %vm1891_vm1 = vcmask 326912  }
 0x47b   :  { %1775 = vadd.xlane.f32.xlu1 %v1774_v48 }
 0x508   :  { %v1776_v49 = vpop.xlane.xlu1 %1775 }
 0x509   :  { %2110 = vrcp.f32 %v1776_v49 }
 0x513   :  { %v2111_v47 = vpop.eup %2110 }
 0x514   :  { %v1786_v50 = vrot.slane %v2111_v47, %v2412_v53  ;;  %v1782_v55 = vrot.slane %v2111_v47, %v2409_v52  ;;  %v1794_v56 = vrot.slane %v2111_v47, %v2421_v59  ;;  %v1790_v2 = vrot.slane %v2111_v47, %v2415_v54 }
 0x515   :  { %v1802_v58 = vrot.slane %v2111_v47, %v2443_v21  ;;  %v1798_v15 = vrot.slane %v2111_v47, %v2428_v62  ;;  %v1810_v53 = vrot.slane %v2111_v47, %v2458_v29  ;;  %v1806_v59 = vrot.slane %v2111_v47, %v2451_v26 }
 0x516   :  { %v1820_v4 = vmul.f32 %v2097_v13, %v1786_v50  ;;  %v1819_v57 = vmul.f32 %v2095_v0, %v1782_v55  ;;  %v1822_v61 = vmul.f32 %v2101_v24, %v1794_v56  ;;  %v1821_v63 = vmul.f32 %v2099_v20, %v1790_v2 }
 0x517   :  { %v1824_v3 = vmul.f32 %v2105_v31, %v1802_v58  ;;  %v1823_v21 = vmul.f32 %v2103_v18, %v1798_v15  ;;  %v1826_v8 = vmul.f32 %v2109_v34, %v1810_v53  ;;  %v1825_v14 = vmul.f32 %v2107_v32, %v1806_v59 }
 0x518   :  { %v1837_v51 = vrot.slane %v1820_v4, %v2409_v52  ;;  %v1830_v60 = vrot.slane %v1819_v57, %v2409_v52  ;;  %v1851_v54 = vrot.slane %v1822_v61, %v2409_v52  ;;  %v1844_v1 = vrot.slane %v1821_v63, %v2409_v52 }
 0x519   :  { %v1865_v62 = vrot.slane %v1824_v3, %v2409_v52  ;;  %v1858_v5 = vrot.slane %v1823_v21, %v2409_v52  ;;  %v1879_v29 = vrot.slane %v1826_v8, %v2409_v52  ;;  %v1872_v26 = vrot.slane %v1825_v14, %v2409_v52 }
 0x51a   :  { %1839 = vbcast.lane.b32.xlu1 %v1837_v51, 256  ;;  %1832 = vbcast.lane.b32.xlu0 %v1830_v60, 256 }
 0x51e   :  { %1853 = vbcast.lane.b32.xlu1 %v1851_v54, 256  ;;  %1846 = vbcast.lane.b32.xlu0 %v1844_v1, 256 }
 0x522   :  { %1867 = vbcast.lane.b32.xlu1 %v1865_v62, 256  ;;  %1860 = vbcast.lane.b32.xlu0 %v1858_v5, 256 }
 0x526   :  { %1881 = vbcast.lane.b32.xlu1 %v1879_v29, 256  ;;  %1874 = vbcast.lane.b32.xlu0 %v1872_v26, 256 }
 0x58c   :  { %v1840_v16 = vpop.permute.xlu1 %1839  ;;  %v1833_v6 = vpop.permute.xlu0 %1832 }
 0x58d   :  { %v1884_v7 = vmul.f32 %v2468_v22, %v1840_v16  ;;  %v1883_v27 = vmul.f32 %v1833_v6, %v2472_v38 }
 0x58f   :  { %v1899_v28 = vsel %vm1891_vm1, %v1884_v7, 0.0  ;;  %v1892_v17 = vsel %vm1891_vm1, %v1883_v27, 0.0 }
 0x590   :  { %v1900_v9 = vrot.slane %v1899_v28, 4  ;;  %v1893_v0 = vrot.slane %v1892_v17, 4  ;;  %v1854_v13 = vpop.permute.xlu1 %1853  ;;  %v1847_v20 = vpop.permute.xlu0 %1846 }
 0x591   :  { %v1886_v25 = vmul.f32 %v2476_v23, %v1854_v13  ;;  %v1885_v52 = vmul.f32 %v1847_v20, %v2478_v39 }
 0x592   :  { %v1901_v24 = vadd.f32 %v1900_v9, %v1899_v28  ;;  %v1894_v18 = vadd.f32 %v1893_v0, %v1892_v17 }
 0x593   :  { %v1913_v10 = vsel %vm1891_vm1, %v1886_v25, 0.0  ;;  %v1906_v22 = vsel %vm1891_vm1, %v1885_v52, 0.0 }
 0x594   :  { %v1902_v30 = vrot.slane %v1901_v24, 2  ;;  %v1895_v38 = vrot.slane %v1894_v18, 2  ;;  %v1914_v31 = vrot.slane %v1913_v10, 4  ;;  %v1907_v32 = vrot.slane %v1906_v22, 4  ;;  %v1868_v19 = vpop.permute.xlu1 %1867  ;;  %v1861_v33 = vpop.permute.xlu0 %1860 }
 0x595   :  { %v1888_v34 = vmul.f32 %v2480_v40, %v1868_v19  ;;  %v1887_v35 = vmul.f32 %v1861_v33, %v2482_v41 }
 0x596   :  { %v1903_v36 = vadd.f32 %v1902_v30, %v1901_v24  ;;  %v1896_v23 = vadd.f32 %v1895_v38, %v1894_v18  ;;  %v1915_v11 = vadd.f32 %v1914_v31, %v1913_v10  ;;  %v1908_v39 = vadd.f32 %v1907_v32, %v1906_v22 }
 0x597   :  { %v1927_v43 = vsel %vm1891_vm1, %v1888_v34, 0.0  ;;  %v1920_v44 = vsel %vm1891_vm1, %v1887_v35, 0.0 }
 0x598   :  { %v1916_v45 = vrot.slane %v1915_v11, 2  ;;  %v1909_v46 = vrot.slane %v1908_v39, 2  ;;  %v1928_v42 = vrot.slane %v1927_v43, 4  ;;  %v1921_v48 = vrot.slane %v1920_v44, 4  ;;  %v1882_v49 = vpop.permute.xlu1 %1881  ;;  %v1875_v47 = vpop.permute.xlu0 %1874 }
 0x599   :  { %v1890_v50 = vmul.f32 %v2470_v37, %v1882_v49  ;;  %v1889_v40 = vmul.f32 %v1875_v47, %v2474_v12  ;;  %v1904_v55 = vrot.slane %v1903_v36, 1  ;;  %v1897_v41 = vrot.slane %v1896_v23, 1 }
 0x59a   :  { %v1917_v56 = vadd.f32 %v1916_v45, %v1915_v11  ;;  %v1910_v2 = vadd.f32 %v1909_v46, %v1908_v39  ;;  %v1929_v4 = vadd.f32 %v1928_v42, %v1927_v43  ;;  %v1922_v57 = vadd.f32 %v1921_v48, %v1920_v44 }
 0x59b   :  { %v1941_v58 = vsel %vm1891_vm1, %v1890_v50, 0.0  ;;  %v1934_v15 = vsel %vm1891_vm1, %v1889_v40, 0.0  ;;  %v1905_v51 = vadd.f32 %v1904_v55, %v1903_v36  ;;  %v1898_v60 = vadd.f32 %v1897_v41, %v1896_v23 }
 0x59c   :  { %v1930_v61 = vrot.slane %v1929_v4, 2  ;;  %v1923_v63 = vrot.slane %v1922_v57, 2  ;;  %v1942_v53 = vrot.slane %v1941_v58, 4  ;;  %v1935_v59 = vrot.slane %v1934_v15, 4 }
 0x59d   :  { %1958 = vrot.lane.b32.xlu1 %v1905_v51, %s2248_s17  ;;  %1956 = vrot.lane.b32.xlu0 %v1898_v60, %s2248_s17  ;;  %v1918_v37 = vrot.slane %v1917_v56, 1  ;;  %v1911_v12 = vrot.slane %v1910_v2, 1 }
 0x59e   :  { %v1931_v54 = vadd.f32 %v1930_v61, %v1929_v4  ;;  %v1924_v1 = vadd.f32 %v1923_v63, %v1922_v57  ;;  %v1943_v3 = vadd.f32 %v1942_v53, %v1941_v58  ;;  %v1936_v21 = vadd.f32 %v1935_v59, %v1934_v15 }
 0x59f   :  { %v1919_v62 = vadd.f32 %v1918_v37, %v1917_v56  ;;  %v1912_v5 = vadd.f32 %v1911_v12, %v1910_v2 }
 0x5a0   :  { %v1944_v8 = vrot.slane %v1943_v3, 2  ;;  %v1937_v14 = vrot.slane %v1936_v21, 2  ;;  %v1932_v29 = vrot.slane %v1931_v54, 1  ;;  %v1925_v26 = vrot.slane %v1924_v1, 1 }
 0x5a1   :  { %1962 = vrot.lane.b32.xlu1 %v1919_v62, %s2248_s17  ;;  %1960 = vrot.lane.b32.xlu0 %v1912_v5, %s2248_s17 }
 0x5a2   :  { %v1945_v16 = vadd.f32 %v1944_v8, %v1943_v3  ;;  %v1938_v6 = vadd.f32 %v1937_v14, %v1936_v21  ;;  %v1933_v7 = vadd.f32 %v1932_v29, %v1931_v54  ;;  %v1926_v27 = vadd.f32 %v1925_v26, %v1924_v1 }
 0x5a4   :  { %v1946_v28 = vrot.slane %v1945_v16, 1  ;;  %v1939_v17 = vrot.slane %v1938_v6, 1 }
 0x5a5   :  { %1966 = vrot.lane.b32.xlu1 %v1933_v7, %s2248_s17  ;;  %1964 = vrot.lane.b32.xlu0 %v1926_v27, %s2248_s17 }
 0x5a6   :  { %v1947_v9 = vadd.f32 %v1946_v28, %v1945_v16  ;;  %v1940_v0 = vadd.f32 %v1939_v17, %v1938_v6 }
 0x5a9   :  { %1970 = vrot.lane.b32.xlu1 %v1947_v9, %s2248_s17  ;;  %1968 = vrot.lane.b32.xlu0 %v1940_v0, %s2248_s17 }
 0x60f   :  { %v1959_v13 = vpop.permute.xlu1 %1958  ;;  %v1957_v20 = vpop.permute.xlu0 %1956 }
 0x610   :  { %1982 = vst.msk [vmem:[#allocation10 + $0x1] sm:$0x1] %vm1980_vm4, %v1959_v13  ;;  %1981 = vst.msk [vmem:[#allocation10] sm:$0x1] %vm1980_vm4, %v1957_v20 }
 0x613   :  { %v1963_v25 = vpop.permute.xlu1 %1962  ;;  %v1961_v52 = vpop.permute.xlu0 %1960 }
 0x614   :  { %1984 = vst.msk [vmem:[#allocation10 + $0x3] sm:$0x1] %vm1980_vm4, %v1963_v25  ;;  %1983 = vst.msk [vmem:[#allocation10 + $0x2] sm:$0x1] %vm1980_vm4, %v1961_v52 }
 0x617   :  { %v1967_v24 = vpop.permute.xlu1 %1966  ;;  %v1965_v18 = vpop.permute.xlu0 %1964 }
 0x618   :  { %1986 = vst.msk [vmem:[#allocation10 + $0x5] sm:$0x1] %vm1980_vm4, %v1967_v24  ;;  %1985 = vst.msk [vmem:[#allocation10 + $0x4] sm:$0x1] %vm1980_vm4, %v1965_v18 }
 0x61b   :  { %v1971_v10 = vpop.permute.xlu1 %1970  ;;  %v1969_v22 = vpop.permute.xlu0 %1968 }
 0x61c   :  { %1988 = vst.msk [vmem:[#allocation10 + $0x7] sm:$0x1] %vm1980_vm4, %v1971_v10  ;;  %1987 = vst.msk [vmem:[#allocation10 + $0x6] sm:$0x1] %vm1980_vm4, %v1969_v22 }
 0x61d   :  { %2215 = shalt.err (!%p2212_p8)
}
 0x61e   :  { %s2216_s25 = scalar_lea.hbm %s2755_s5, 128 }
 0x61f   :  { %p2217_p9 = scmp.ne.s32.totalorder %s2755_s5, %s2216_s25  ;;  %p2220_p10 = scmp.lt.u32.totalorder %s2216_s25, %s2755_s5 }
 0x621   :  { %p2222_p11 = pnand %p2220_p10, %p2217_p9 }
 0x623   :  { %2225 = shalt.err (!%p2222_p11)
}
 0x624   :  { %2000 = dma.vmem_to_hbm [thread:$0]  %s1995_s21, 128, %s2755_s5, [#allocation4], %s2235_s28, %s2235_s28, %s2236_s29  }
 0x625   :  { %2232 = dma.done.wait [#allocation4], 128  }
 0x626   :  { %2233 = vsyncadd [#allocation4], 4294967168 }
 0x627   :  { %2004 = vsyncpa [#allocation3], 1 }
 0x628   :  { %2005 = vsyncpa [#allocation6], 1 }
 0x629   :  { %2006 = vsyncpa [#allocation9], 1 }
 0x62a   :  { %2007 = vsyncpa [#allocation4], 1 }

</bundles_post_ra>
